<compile_context>
chip_gen: v7x
topology: tpu7x:2x2x1
jax: 0.10.0
libtpu: 0.0.40
codegen_flags: <defaults>
</compile_context>

<pallas_src>
import numpy as np
import jax
import jax.numpy as jnp
from jax.experimental import pallas as pl
from jax.experimental.pallas import tpu as pltpu

# ---------------- problem sizes (small, synthetic) ----------------
BATCH = 8          # avoid 3 so get_scale()'s len(scale)==3 branch never triggers
INPUT_DIM = 16
LATENT = 8
HIDDEN = (32, 32)  # `layers` of the dense_net
H0, H1 = HIDDEN

_HALF_LOG_2PI = 0.5 * float(np.log(2.0 * np.pi))
_OUT_LANES = 128   # lane-dense output slab width (one f32 vreg at B=8)

# ---------------- packed parameter layout ----------------
# (name, n_rows, n_cols); all tensors are zero-padded to _PACK_W columns and
# stacked along rows into one buffer.  Head weights/biases are pre-split so
# the kernel gets z_mean / z_log_sigma / x_prime / log_scale as clean matmul
# outputs (no column-offset slicing of fused outputs).  Biases are replicated
# to BATCH rows so the kernel never does a single-sublane pick + broadcast.
_WEIGHT_ENTRIES = (
    ("ew0", INPUT_DIM, H0), ("ew1", H0, H1),
    ("ew2m", H1, LATENT), ("ew2s", H1, LATENT),
    ("dw0", LATENT, H0), ("dw1", H0, H1),
    ("dw2m", H1, INPUT_DIM), ("dw2s", H1, INPUT_DIM),
)
_BIAS_ENTRIES = (
    ("eb0", BATCH, H0), ("eb1", BATCH, H1),
    ("eb2m", BATCH, LATENT), ("eb2s", BATCH, LATENT),
    ("db0", BATCH, H0), ("db1", BATCH, H1),
    ("db2m", BATCH, INPUT_DIM), ("db2s", BATCH, INPUT_DIM),
)
_PACK_ENTRIES = _WEIGHT_ENTRIES + _BIAS_ENTRIES
_PACK_W = max(c for _, _, c in _PACK_ENTRIES)            # 32
_PACK_OFFSETS = {}
_off = 0
for _name, _r, _c in _PACK_ENTRIES:
    # Every block must start at an 8-multiple row so static slices stay
    # sublane-aligned (no silent relayout if the ordering ever changes).
    assert _off % 8 == 0, f"packed block {_name} starts at unaligned row {_off}"
    assert _r % 8 == 0, f"packed block {_name} has non-8-multiple rows {_r}"
    _PACK_OFFSETS[_name] = (_off, _r, _c)
    _off += _r
_PACK_ROWS = ((_off + 7) // 8) * 8                        # 280 (sublane multiple)

# merged input buffer: data rows [0, BATCH), eps rows [BATCH, 2*BATCH)
_IN_ROWS = 2 * BATCH
_IN_COLS = INPUT_DIM                                      # LATENT <= INPUT_DIM


# ---------------- Pallas kernel ----------------
def _vae_logprob_kernel(io_ref, p_ref, out_ref):
    x = io_ref[0:BATCH, :]                         # (B, D)  f32, sublane offset 0
    eps = io_ref[BATCH:2 * BATCH, :LATENT]         # (B, L)  f32, sublane offset 8
    f32 = jnp.float32

    def P(name):
        off, rows, cols = _PACK_OFFSETS[name]
        return p_ref[off:off + rows, :cols]        # static slice, lane offset 0

    # ---- encoder MLP: D -> H0 -> H1 -> (L, L), relu between hidden layers ----
    h = jnp.maximum(jnp.dot(x, P("ew0"), preferred_element_type=f32) + P("eb0"), 0.0)
    h = jnp.maximum(jnp.dot(h, P("ew1"), preferred_element_type=f32) + P("eb1"), 0.0)
    z_mean = jnp.dot(h, P("ew2m"), preferred_element_type=f32) + P("eb2m")       # (B, L)
    z_log_sigma = jnp.dot(h, P("ew2s"), preferred_element_type=f32) + P("eb2s")  # (B, L)

    # ---- reparameterization: std = exp(log_sigma / 2), z = mu + std * eps ----
    std = jnp.exp(0.5 * z_log_sigma)
    z = z_mean + std * eps

    # ---- KL term: sum[ log q(z|x) - log p(z) ]  (log(2*pi) terms cancel,
    #      -log(std) == -0.5*z_log_sigma, ((z-mu)/std)^2 == eps^2) ----
    kl = jnp.sum(0.5 * (z * z - eps * eps) - 0.5 * z_log_sigma,
                 axis=-1, keepdims=True)                                         # (B, 1)

    # ---- decoder MLP: L -> H0 -> H1 -> (D, D) ----
    g = jnp.maximum(jnp.dot(z, P("dw0"), preferred_element_type=f32) + P("db0"), 0.0)
    g = jnp.maximum(jnp.dot(g, P("dw1"), preferred_element_type=f32) + P("db1"), 0.0)
    x_prime = jnp.dot(g, P("dw2m"), preferred_element_type=f32) + P("db2m")      # (B, D)
    log_scale = jnp.dot(g, P("dw2s"), preferred_element_type=f32) + P("db2s")    # (B, D)

    # ---- Gaussian likelihood of (data + 0.5) under N(x_prime, exp(log_scale)) ----
    inv_scale = jnp.exp(-log_scale)                      # 1/scale, no divide / no log
    diff = (x + 0.5 - x_prime) * inv_scale
    log_lik = -log_scale - _HALF_LOG_2PI - 0.5 * diff * diff
    per_sample_lik = jnp.sum(log_lik, axis=-1, keepdims=True)                    # (B, 1)

    # preprocess is None  =>  prep_likelihood == 0
    total = per_sample_lik - kl                                                  # (B, 1)
    # lane-dense store: full (B, 128) slab, unmasked vst; wrapper slices col 0
    out_ref[...] = jnp.broadcast_to(total, (BATCH, _OUT_LANES))


# ---------------- cost estimate (advisory, tiny kernel) ----------------
_MATMUL_FLOPS = 2 * BATCH * sum(r * c for _, r, c in _WEIGHT_ENTRIES)
_COST = pl.CostEstimate(
    flops=_MATMUL_FLOPS,
    transcendentals=BATCH * (LATENT + INPUT_DIM),
    bytes_accessed=(_IN_ROWS * _IN_COLS + _PACK_ROWS * _PACK_W
                    + BATCH * _OUT_LANES) * 4,
)


def vae_log_prob(packed_io, packed_params):
    """packed_io: (2*B, D) [data rows 0:B, eps rows B:2B], packed_params: (280, 32)."""
    vmem = pl.BlockSpec(memory_space=pltpu.MemorySpace.VMEM)
    out = pl.pallas_call(
        _vae_logprob_kernel,
        out_shape=jax.ShapeDtypeStruct((BATCH, _OUT_LANES), jnp.float32),
        in_specs=[vmem, vmem],
        out_specs=vmem,
        cost_estimate=_COST,
    )(packed_io, packed_params)
    return out[:, 0]


# ---------------- host/XLA-side glue: input & parameter packing ----------------
def _pack_inputs(data, eps):
    buf = jnp.zeros((_IN_ROWS, _IN_COLS), jnp.float32)
    buf = buf.at[:BATCH, :INPUT_DIM].set(data.astype(jnp.float32))
    buf = buf.at[BATCH:, :LATENT].set(eps.astype(jnp.float32))
    return buf


def _pack_params(p):
    """Split the fused heads, replicate biases to BATCH rows, pack into one buffer."""
    split = dict(
        ew0=p["ew0"], ew1=p["ew1"], dw0=p["dw0"], dw1=p["dw1"],
        eb0=p["eb0"], eb1=p["eb1"], db0=p["db0"], db1=p["db1"],
        ew2m=p["ew2"][:, :LATENT], ew2s=p["ew2"][:, LATENT:],
        eb2m=p["eb2"][:, :LATENT], eb2s=p["eb2"][:, LATENT:],
        dw2m=p["dw2"][:, :INPUT_DIM], dw2s=p["dw2"][:, INPUT_DIM:],
        db2m=p["db2"][:, :INPUT_DIM], db2s=p["db2"][:, INPUT_DIM:],
    )
    buf = jnp.zeros((_PACK_ROWS, _PACK_W), jnp.float32)
    for name, rows, cols in _PACK_ENTRIES:
        off, r, c = _PACK_OFFSETS[name]
        block = split[name].astype(jnp.float32)
        if block.shape[0] == 1 and r == BATCH:        # bias: replicate to 8 rows
            block = jnp.broadcast_to(block, (BATCH, c))
        buf = buf.at[off:off + r, :c].set(block)
    return buf


# ---------------- deterministic parameter init (synthetic) ----------------
def _init_params(key):
    def linear(key, fan_in, fan_out):
        kw, kb = jax.random.split(key)
        bound = 1.0 / np.sqrt(fan_in)
        w = jax.random.uniform(kw, (fan_in, fan_out), jnp.float32, -bound, bound)
        b = jax.random.uniform(kb, (1, fan_out), jnp.float32, -bound, bound)
        return w, b

    keys = jax.random.split(key, 6)
    params = {}
    # encoder: INPUT_DIM -> H0 -> H1 -> 2*LATENT      (dense_net(..., vae=True))
    params["ew0"], params["eb0"] = linear(keys[0], INPUT_DIM, H0)
    params["ew1"], params["eb1"] = linear(keys[1], H0, H1)
    params["ew2"], params["eb2"] = linear(keys[2], H1, 2 * LATENT)
    # decoder: LATENT -> H0 -> H1 -> 2*INPUT_DIM
    params["dw0"], params["db0"] = linear(keys[3], LATENT, H0)
    params["dw1"], params["db1"] = linear(keys[4], H0, H1)
    params["dw2"], params["db2"] = linear(keys[5], H1, 2 * INPUT_DIM)
    return params


# ---------------- pure-JAX reference (for correctness check) ----------------
def _ref_log_prob(data, eps, p):
    h = jax.nn.relu(data @ p["ew0"] + p["eb0"])
    h = jax.nn.relu(h @ p["ew1"] + p["eb1"])
    enc = h @ p["ew2"] + p["eb2"]
    z_mean, z_log_sigma = enc[:, :LATENT], enc[:, LATENT:]
    std = jnp.exp(z_log_sigma / 2.0)
    z = z_mean + std * eps
    log_qzx = -jnp.log(std) - _HALF_LOG_2PI - 0.5 * ((z - z_mean) / std) ** 2
    log_pz = -_HALF_LOG_2PI - 0.5 * z ** 2
    kl = jnp.sum(log_qzx - log_pz, axis=-1)
    g = jax.nn.relu(z @ p["dw0"] + p["db0"])
    g = jax.nn.relu(g @ p["dw1"] + p["db1"])
    dec = g @ p["dw2"] + p["db2"]
    x_prime, log_scale = dec[:, :INPUT_DIM], dec[:, INPUT_DIM:]
    scale = jnp.exp(log_scale)
    target = data + 0.5
    ll = jnp.sum(-jnp.log(scale) - _HALF_LOG_2PI - 0.5 * ((target - x_prime) / scale) ** 2,
                 axis=-1)
    return ll - kl


if __name__ == "__main__":
    key = jax.random.PRNGKey(0)
    k_data, k_eps, k_params = jax.random.split(key, 3)

    data = jax.random.normal(k_data, (BATCH, INPUT_DIM), jnp.float32)
    # epsilon ~ N(0, 1) for the reparameterization (generated as glue, passed in)
    eps = jax.random.normal(k_eps, (BATCH, LATENT), jnp.float32)
    params = _init_params(k_params)

    packed_io = _pack_inputs(data, eps)
    packed = _pack_params(params)

    out = vae_log_prob(packed_io, packed)
    out = jax.block_until_ready(out)

    ref = _ref_log_prob(data, eps, params)
    np.testing.assert_allclose(np.asarray(out), np.asarray(ref), rtol=1e-4, atol=1e-4)

    # TODO(synk): nsf_dec=True path (neural spline flow decoder log_prob) and the
    # optional `preprocess` hook have no clean Pallas equivalent here.
    print("KERNEL_OK")
</pallas_src>

<mosaic_0001>
module attributes {stable_mosaic.version = 11 : i64} {
  func.func @_vae_logprob_kernel(%arg0: memref<16x16xf32, #tpu.memory_space<vmem>>, %arg1: memref<280x32xf32, #tpu.memory_space<vmem>>, %arg2: memref<8x128xf32, #tpu.memory_space<vmem>>) attributes {dimension_semantics = [], scalar_prefetch = 0 : i64, scratch_operands = 0 : i64, tpu.core_type = #tpu.core_type<tc>} {
    %c0 = arith.constant 0 : index
    %c0_0 = arith.constant 0 : index
    %0 = vector.load %arg0[%c0, %c0_0] : memref<16x16xf32, #tpu.memory_space<vmem>>, vector<8x16xf32>
    %c8 = arith.constant 8 : index
    %c0_1 = arith.constant 0 : index
    %1 = vector.load %arg0[%c8, %c0_1] : memref<16x16xf32, #tpu.memory_space<vmem>>, vector<8x8xf32>
    %c0_2 = arith.constant 0 : index
    %c0_3 = arith.constant 0 : index
    %2 = vector.load %arg1[%c0_2, %c0_3] : memref<280x32xf32, #tpu.memory_space<vmem>>, vector<16x32xf32>
    %cst = arith.constant dense<0.000000e+00> : vector<8x32xf32>
    %3 = tpu.matmul %0, %2, %cst {dimension_numbers = #tpu.dot_dimension_numbers<[1], [0], [0], [1], [0, 0, 1, 1], [], []>} : vector<8x16xf32>, vector<16x32xf32>, vector<8x32xf32> -> vector<8x32xf32>
    %c216 = arith.constant 216 : index
    %c0_4 = arith.constant 0 : index
    %4 = vector.load %arg1[%c216, %c0_4] : memref<280x32xf32, #tpu.memory_space<vmem>>, vector<8x32xf32>
    %5 = arith.addf %3, %4 : vector<8x32xf32>
    %cst_5 = arith.constant 0.000000e+00 : f32
    %6 = vector.broadcast %cst_5 : f32 to vector<8x32xf32>
    %7 = arith.maximumf %5, %6 : vector<8x32xf32>
    %c16 = arith.constant 16 : index
    %c0_6 = arith.constant 0 : index
    %8 = vector.load %arg1[%c16, %c0_6] : memref<280x32xf32, #tpu.memory_space<vmem>>, vector<32x32xf32>
    %cst_7 = arith.constant dense<0.000000e+00> : vector<8x32xf32>
    %9 = tpu.matmul %7, %8, %cst_7 {dimension_numbers = #tpu.dot_dimension_numbers<[1], [0], [0], [1], [0, 0, 1, 1], [], []>} : vector<8x32xf32>, vector<32x32xf32>, vector<8x32xf32> -> vector<8x32xf32>
    %c224 = arith.constant 224 : index
    %c0_8 = arith.constant 0 : index
    %10 = vector.load %arg1[%c224, %c0_8] : memref<280x32xf32, #tpu.memory_space<vmem>>, vector<8x32xf32>
    %11 = arith.addf %9, %10 : vector<8x32xf32>
    %cst_9 = arith.constant 0.000000e+00 : f32
    %12 = vector.broadcast %cst_9 : f32 to vector<8x32xf32>
    %13 = arith.maximumf %11, %12 : vector<8x32xf32>
    %c48 = arith.constant 48 : index
    %c0_10 = arith.constant 0 : index
    %14 = vector.load %arg1[%c48, %c0_10] : memref<280x32xf32, #tpu.memory_space<vmem>>, vector<32x8xf32>
    %cst_11 = arith.constant dense<0.000000e+00> : vector<8x8xf32>
    %15 = tpu.matmul %13, %14, %cst_11 {dimension_numbers = #tpu.dot_dimension_numbers<[1], [0], [0], [1], [0, 0, 1, 1], [], []>} : vector<8x32xf32>, vector<32x8xf32>, vector<8x8xf32> -> vector<8x8xf32>
    %c232 = arith.constant 232 : index
    %c0_12 = arith.constant 0 : index
    %16 = vector.load %arg1[%c232, %c0_12] : memref<280x32xf32, #tpu.memory_space<vmem>>, vector<8x8xf32>
    %17 = arith.addf %15, %16 : vector<8x8xf32>
    %c80 = arith.constant 80 : index
    %c0_13 = arith.constant 0 : index
    %18 = vector.load %arg1[%c80, %c0_13] : memref<280x32xf32, #tpu.memory_space<vmem>>, vector<32x8xf32>
    %cst_14 = arith.constant dense<0.000000e+00> : vector<8x8xf32>
    %19 = tpu.matmul %13, %18, %cst_14 {dimension_numbers = #tpu.dot_dimension_numbers<[1], [0], [0], [1], [0, 0, 1, 1], [], []>} : vector<8x32xf32>, vector<32x8xf32>, vector<8x8xf32> -> vector<8x8xf32>
    %c240 = arith.constant 240 : index
    %c0_15 = arith.constant 0 : index
    %20 = vector.load %arg1[%c240, %c0_15] : memref<280x32xf32, #tpu.memory_space<vmem>>, vector<8x8xf32>
    %21 = arith.addf %19, %20 : vector<8x8xf32>
    %cst_16 = arith.constant 5.000000e-01 : f32
    %22 = vector.broadcast %cst_16 : f32 to vector<8x8xf32>
    %23 = arith.mulf %22, %21 : vector<8x8xf32>
    %24 = math.exp %23 : vector<8x8xf32>
    %25 = arith.mulf %24, %1 : vector<8x8xf32>
    %26 = arith.addf %17, %25 : vector<8x8xf32>
    %27 = arith.mulf %26, %26 : vector<8x8xf32>
    %28 = arith.mulf %1, %1 : vector<8x8xf32>
    %29 = arith.subf %27, %28 : vector<8x8xf32>
    %cst_17 = arith.constant 5.000000e-01 : f32
    %30 = vector.broadcast %cst_17 : f32 to vector<8x8xf32>
    %31 = arith.mulf %30, %29 : vector<8x8xf32>
    %cst_18 = arith.constant 5.000000e-01 : f32
    %32 = vector.broadcast %cst_18 : f32 to vector<8x8xf32>
    %33 = arith.mulf %32, %21 : vector<8x8xf32>
    %34 = arith.subf %31, %33 : vector<8x8xf32>
    %cst_19 = arith.constant dense<0.000000e+00> : vector<8xf32>
    %35 = vector.multi_reduction <add>, %34, %cst_19 [1] : vector<8x8xf32> to vector<8xf32>
    %36 = vector.shape_cast %35 : vector<8xf32> to vector<8x1xf32>
    %c112 = arith.constant 112 : index
    %c0_20 = arith.constant 0 : index
    %37 = vector.load %arg1[%c112, %c0_20] : memref<280x32xf32, #tpu.memory_space<vmem>>, vector<8x32xf32>
    %cst_21 = arith.constant dense<0.000000e+00> : vector<8x32xf32>
    %38 = tpu.matmul %26, %37, %cst_21 {dimension_numbers = #tpu.dot_dimension_numbers<[1], [0], [0], [1], [0, 0, 1, 1], [], []>} : vector<8x8xf32>, vector<8x32xf32>, vector<8x32xf32> -> vector<8x32xf32>
    %c248 = arith.constant 248 : index
    %c0_22 = arith.constant 0 : index
    %39 = vector.load %arg1[%c248, %c0_22] : memref<280x32xf32, #tpu.memory_space<vmem>>, vector<8x32xf32>
    %40 = arith.addf %38, %39 : vector<8x32xf32>
    %cst_23 = arith.constant 0.000000e+00 : f32
    %41 = vector.broadcast %cst_23 : f32 to vector<8x32xf32>
    %42 = arith.maximumf %40, %41 : vector<8x32xf32>
    %c120 = arith.constant 120 : index
    %c0_24 = arith.constant 0 : index
    %43 = vector.load %arg1[%c120, %c0_24] : memref<280x32xf32, #tpu.memory_space<vmem>>, vector<32x32xf32>
    %cst_25 = arith.constant dense<0.000000e+00> : vector<8x32xf32>
    %44 = tpu.matmul %42, %43, %cst_25 {dimension_numbers = #tpu.dot_dimension_numbers<[1], [0], [0], [1], [0, 0, 1, 1], [], []>} : vector<8x32xf32>, vector<32x32xf32>, vector<8x32xf32> -> vector<8x32xf32>
    %c256 = arith.constant 256 : index
    %c0_26 = arith.constant 0 : index
    %45 = vector.load %arg1[%c256, %c0_26] : memref<280x32xf32, #tpu.memory_space<vmem>>, vector<8x32xf32>
    %46 = arith.addf %44, %45 : vector<8x32xf32>
    %cst_27 = arith.constant 0.000000e+00 : f32
    %47 = vector.broadcast %cst_27 : f32 to vector<8x32xf32>
    %48 = arith.maximumf %46, %47 : vector<8x32xf32>
    %c152 = arith.constant 152 : index
    %c0_28 = arith.constant 0 : index
    %49 = vector.load %arg1[%c152, %c0_28] : memref<280x32xf32, #tpu.memory_space<vmem>>, vector<32x16xf32>
    %cst_29 = arith.constant dense<0.000000e+00> : vector<8x16xf32>
    %50 = tpu.matmul %48, %49, %cst_29 {dimension_numbers = #tpu.dot_dimension_numbers<[1], [0], [0], [1], [0, 0, 1, 1], [], []>} : vector<8x32xf32>, vector<32x16xf32>, vector<8x16xf32> -> vector<8x16xf32>
    %c264 = arith.constant 264 : index
    %c0_30 = arith.constant 0 : index
    %51 = vector.load %arg1[%c264, %c0_30] : memref<280x32xf32, #tpu.memory_space<vmem>>, vector<8x16xf32>
    %52 = arith.addf %50, %51 : vector<8x16xf32>
    %c184 = arith.constant 184 : index
    %c0_31 = arith.constant 0 : index
    %53 = vector.load %arg1[%c184, %c0_31] : memref<280x32xf32, #tpu.memory_space<vmem>>, vector<32x16xf32>
    %cst_32 = arith.constant dense<0.000000e+00> : vector<8x16xf32>
    %54 = tpu.matmul %48, %53, %cst_32 {dimension_numbers = #tpu.dot_dimension_numbers<[1], [0], [0], [1], [0, 0, 1, 1], [], []>} : vector<8x32xf32>, vector<32x16xf32>, vector<8x16xf32> -> vector<8x16xf32>
    %c272 = arith.constant 272 : index
    %c0_33 = arith.constant 0 : index
    %55 = vector.load %arg1[%c272, %c0_33] : memref<280x32xf32, #tpu.memory_space<vmem>>, vector<8x16xf32>
    %56 = arith.addf %54, %55 : vector<8x16xf32>
    %cst_34 = arith.constant 0.000000e+00 : f32
    %57 = vector.broadcast %cst_34 : f32 to vector<8x16xf32>
    %58 = arith.subf %57, %56 : vector<8x16xf32>
    %59 = math.exp %58 : vector<8x16xf32>
    %cst_35 = arith.constant 5.000000e-01 : f32
    %60 = vector.broadcast %cst_35 : f32 to vector<8x16xf32>
    %61 = arith.addf %0, %60 : vector<8x16xf32>
    %62 = arith.subf %61, %52 : vector<8x16xf32>
    %63 = arith.mulf %62, %59 : vector<8x16xf32>
    %cst_36 = arith.constant 0.000000e+00 : f32
    %64 = vector.broadcast %cst_36 : f32 to vector<8x16xf32>
    %65 = arith.subf %64, %56 : vector<8x16xf32>
    %cst_37 = arith.constant 0.918938517 : f32
    %66 = vector.broadcast %cst_37 : f32 to vector<8x16xf32>
    %67 = arith.subf %65, %66 : vector<8x16xf32>
    %cst_38 = arith.constant 5.000000e-01 : f32
    %68 = vector.broadcast %cst_38 : f32 to vector<8x16xf32>
    %69 = arith.mulf %68, %63 : vector<8x16xf32>
    %70 = arith.mulf %69, %63 : vector<8x16xf32>
    %71 = arith.subf %67, %70 : vector<8x16xf32>
    %cst_39 = arith.constant dense<0.000000e+00> : vector<8xf32>
    %72 = vector.multi_reduction <add>, %71, %cst_39 [1] : vector<8x16xf32> to vector<8xf32>
    %73 = vector.shape_cast %72 : vector<8xf32> to vector<8x1xf32>
    %74 = arith.subf %73, %36 : vector<8x1xf32>
    %75 = vector.shape_cast %74 : vector<8x1xf32> to vector<8x1xf32>
    %76 = vector.broadcast %75 : vector<8x1xf32> to vector<8x128xf32>
    %c0_40 = arith.constant 0 : index
    %c0_41 = arith.constant 0 : index
    %77 = vector.load %arg2[%c0_40, %c0_41] : memref<8x128xf32, #tpu.memory_space<vmem>>, vector<8x128xf32>
    tpu.vector_store %arg2[%c0_40, %c0_41], %76 {strides = array<i32>} : memref<8x128xf32, #tpu.memory_space<vmem>>, vector<8x128xf32>,
    return
  }
}

</mosaic_0001>

<bundles_post_ra>
// kernel: tpu_custom_call.1
= control target key start
LH: loop header
LB: loop body
LE: loop exit
PB: predicated region body
PF: predicated region fallthrough
CT: control target
= control target key end

     0   :  { %v869_v2 = vmov 0.0|0.0   ;;  %vm870_vm0 = vmmov 0   ;;  %v871_v4 = vmov 0.0   ;;  %s1053_s0 = inlined_call_operand.vmem [shape: f32[16,16], index: 0, kind: input, shape index: {}]   ;;  %s1054_s1 = inlined_call_operand.vmem [shape: f32[280,32], index: 1, kind: input, shape index: {}]   ;;  %s1055_s2 = inlined_call_operand.hbm [shape: f32[8,128], index: 2, kind: output, shape index: {}]  }
   0x1   :  { %v14_v0 = vld [vmem:[%s1054_s1] sm:$0xff]  ;;  %v15_v1 = vld [vmem:[%s1054_s1 + $0x8] sm:$0xff]  ;;  %798 = vmatprep.subr.bf16.mxu1 %v869_v2  ;;  %724 = vmatprep.mubr.msk.f32.mxu1 %vm870_vm0, %v871_v4  ;;  %v92_v5 = vld [vmem:[%s1054_s1 + $0x10] sm:$0xff] }
   0x2   :  { %v799_v3 = vpack.c.bf16 %v15_v1, %v14_v0  ;;  %v93_v6 = vld [vmem:[%s1054_s1 + $0x18] sm:$0xff]  ;;  %807 = vmatprep.subr.bf16.mxu0 %v869_v2  ;;  %746 = vmatprep.mubr.msk.f32.mxu0 %vm870_vm0, %v871_v4 }
   0x3   :  { %7 = vsyncpa [#allocation3], 0  ;;  %v909_v7 = vld [vmem:[%s1053_s0] sm:$0xff]  ;;  %vm17_vm1 = vcmask 130048   ;;  %v802_v8 = vpack.c.bf16 %v93_v6, %v92_v5  ;;  %v95_v10 = vld [vmem:[%s1054_s1 + $0x28] sm:$0xff]  ;;  %vm97_vm2 = vcmask 261120  }
   0x4   :  { %800 = vmatpush3.bf16.msra.mxu1 %v799_v3  ;;  %v94_v9 = vld [vmem:[%s1054_s1 + $0x20] sm:$0xff]  ;;  %v172_v12 = vld [vmem:[%s1054_s1 + $0x30] sm:$0xff]  ;;  %v173_v13 = vld [vmem:[%s1054_s1 + $0x38] sm:$0xff]  ;;  %vm335_vm3 = vcmask 64512   ;;  %s872_s25 = smov [#allocation2]  }
   0x5   :  { %801 = vmatprep.subr.bf16.mxu1 %v869_v2  ;;  %v805_v11 = vpack.c.bf16 %v95_v10, %v94_v9  ;;  %v808_v14 = vpack.c.bf16 %v173_v13, %v172_v12  ;;  %v16_v15 = vld [vmem:[%s1054_s1 + $0xd8] sm:$0xff]  ;;  %v250_v16 = vld [vmem:[%s1054_s1 + $0x50] sm:$0xff]  ;;  %v174_v23 = vld [vmem:[%s1054_s1 + $0x40] sm:$0xff]  ;;  %s668_s26 = sshll.u32 %s872_s25, 4  ;;  %s669_s26 = int_to_ptr.vmem [resolvable:$true] %s668_s26 }
   0x6   :  { %v251_v17 = vld [vmem:[%s1054_s1 + $0x58] sm:$0xff]  ;;  %v175_v24 = vld [vmem:[%s1054_s1 + $0x48] sm:$0xff]  ;;  %v252_v25 = vld [vmem:[%s1054_s1 + $0x60] sm:$0xff]  ;;  %p850_p1 = scmp.lt.s32.totalorder %s669_s26, %s669_s26 }
   0x7   :  { %725 = vmatmul.mubr.msk.f32.vlgmr.msra.gmra.mrb[0].mxu1 %vm17_vm1, %v909_v7  ;;  %809 = vmatpush3.bf16.msra.mxu0 %v808_v14  ;;  %v814_v21 = vpack.c.bf16 %v251_v17, %v250_v16  ;;  %v811_v26 = vpack.c.bf16 %v175_v24, %v174_v23  ;;  %v253_v27 = vld [vmem:[%s1054_s1 + $0x68] sm:$0xff]  ;;  %v96_v29 = vld [vmem:[%s1054_s1 + $0xe0] sm:$0xff]  ;;  %v339_v34 = vld [vmem:[%s1054_s1 + $0x70] sm:$0xff] }
   0x8   :  { %803 = vmatpush3.bf16.msra.mxu1 %v802_v8  ;;  %735 = vmatprep.mubr.msk.f32.mxu1 %vm870_vm0, %v871_v4  ;;  %v817_v28 = vpack.c.bf16 %v253_v27, %v252_v25  ;;  %v254_v35 = vld [vmem:[%s1054_s1 + $0xf0] sm:$0xff]  ;;  %v176_v43 = vld [vmem:[%s1054_s1 + $0xe8] sm:$0xff]  ;;  %v415_v55 = vld [vmem:[%s1054_s1 + $0x78] sm:$0xff] }
   0x9   :  { %804 = vmatprep.subr.bf16.mxu1 %v869_v2  ;;  %810 = vmatprep.subr.bf16.mxu0 %v869_v2  ;;  %v13_v44 = vld [vmem:[%s1053_s0 + $0x8] sm:$0xff]  ;;  %v416_v56 = vld [vmem:[%s1054_s1 + $0x80] sm:$0xff]  ;;  %v418_v59 = vld [vmem:[%s1054_s1 + $0x90] sm:$0xff] }
   0xa   :  { %v331_v49 = vmul.f32 %v13_v44, %v13_v44  ;;  %v820_v57 = vpack.c.bf16 %v416_v56, %v415_v55  ;;  %v417_v58 = vld [vmem:[%s1054_s1 + $0x88] sm:$0xff]  ;;  %v494_v61 = vld [vmem:[%s1054_s1 + $0x98] sm:$0xff]  ;;  %v495_v62 = vld [vmem:[%s1054_s1 + $0xa0] sm:$0xff] }
   0xb   :  { %812 = vmatpush3.bf16.msra.mxu0 %v811_v26  ;;  %v823_v60 = vpack.c.bf16 %v418_v59, %v417_v58  ;;  %v826_v63 = vpack.c.bf16 %v495_v62, %v494_v61  ;;  %v340_v0 = vld [vmem:[%s1054_s1 + $0xf8] sm:$0xff]  ;;  %v573_v3 = vld [vmem:[%s1054_s1 + $0xc0] sm:$0xff]  ;;  %v497_v12 = vld [vmem:[%s1054_s1 + $0xb0] sm:$0xff] }
   0xc   :  { %806 = vmatpush3.bf16.msra.mxu1 %v805_v11  ;;  %760 = vmatprep.subr.mxu0 %v871_v4  ;;  %v572_v1 = vld [vmem:[%s1054_s1 + $0xb8] sm:$0xff]  ;;  %v496_v11 = vld [vmem:[%s1054_s1 + $0xa8] sm:$0xff] }
   0xd   :  { %813 = vmatprep.subr.bf16.mxu1 %v869_v2  ;;  %v832_v9 = vpack.c.bf16 %v573_v3, %v572_v1  ;;  %v574_v13 = vld [vmem:[%s1054_s1 + $0xc8] sm:$0xff]  ;;  %v829_v14 = vpack.c.bf16 %v497_v12, %v496_v11 }
  0xda   :  { %v87_v18 = vpop.f32.mrb[0].mxu1 }
  0xdb   :  { %v88_v19 = vadd.f32 %v87_v18, %v16_v15  ;;  %v726_v20 = vpop.f32.mrb[1].mxu1  ;;  %v575_v15 = vld [vmem:[%s1054_s1 + $0xd0] sm:$0xff] }
  0xdc   :  { %v576_v20 = vld [vmem:[%s1054_s1 + $0x110] sm:$0xff] }
  0xdd   :  { %v91_v22 = vmax.f32 %v88_v19, 0.0 }
  0xdf   :  { %736 = vmatmul.mubr.msk.f32.vlgmr.msra.gmra.mrb[2].mxu1 %vm97_vm2, %v91_v22 }
  0xe0   :  { %815 = vmatpush3.bf16.msra.mxu1 %v814_v21  ;;  %757 = vmatprep.mubr.msk.f32.mxu1 %vm870_vm0, %v871_v4 }
  0xe1   :  { %816 = vmatprep.subr.bf16.mxu1 %v869_v2 }
  0xe4   :  { %818 = vmatpush3.bf16.msra.mxu1 %v817_v28  ;;  %v498_v28 = vld [vmem:[%s1054_s1 + $0x108] sm:$0xff] }
  0xe5   :  { %825 = vmatprep.subr.bf16.mxu1 %v869_v2 }
 0x1b2   :  { %v167_v30 = vpop.f32.mrb[2].mxu1 }
 0x1b3   :  { %v168_v31 = vadd.f32 %v167_v30, %v96_v29  ;;  %v737_v32 = vpop.f32.mrb[3].mxu1  ;;  %v650_v30 = vadd.f32 0.5, %v909_v7 }
 0x1b5   :  { %v171_v33 = vmax.f32 %v168_v31, 0.0 }
 0x1b7   :  { %747 = vmatmul.mubr.msk.f32.vlgmr.msra.gmra.mrb[0].mxu0 %vm97_vm2, %v171_v33  ;;  %758 = vmatmul.mubr.msk.f32.vlgmr.msra.gmra.mrb[4].mxu1 %vm97_vm2, %v171_v33 }
 0x1b8   :  { %762 = vmatprep.mubr.msk.f32.mxu0 %vm870_vm0, %v871_v4  ;;  %784 = vmatprep.mubr.msk.f32.mxu1 %vm870_vm0, %v871_v4 }
 0x1b9   :  { %761 = vmatpush3.msra.mxu0 %v339_v34  ;;  %827 = vmatpush3.bf16.msra.mxu1 %v826_v63 }
 0x1ba   :  { %819 = vmatprep.subr.bf16.mxu0 %v869_v2  ;;  %828 = vmatprep.subr.bf16.mxu1 %v869_v2 }
 0x1bd   :  { %830 = vmatpush3.bf16.msra.mxu1 %v829_v14 }
 0x28a   :  { %v246_v36 = vpop.f32.mrb[0].mxu0  ;;  %v321_v37 = vpop.f32.mrb[4].mxu1 }
 0x28b   :  { %v322_v38 = vadd.f32 %v321_v37, %v254_v35  ;;  %v748_v39 = vpop.f32.mrb[1].mxu0  ;;  %v759_v40 = vpop.f32.mrb[5].mxu1  ;;  %v247_v46 = vadd.f32 %v246_v36, %v176_v43 }
 0x28d   :  { %v325_v41 = vmul.f32 0.5, %v322_v38 }
 0x28f   :  { %v326_v42 = vmul.f32 1.442695, %v325_v41 }
 0x291   :  { %841 = vpow2.f32 %v326_v42 }
 0x29b   :  { %v842_v45 = vpop.eup %841 }
 0x29c   :  { %v328_v47 = vmul.f32 %v842_v45, %v13_v44 }
 0x29e   :  { %v329_v48 = vadd.f32 %v328_v47, %v247_v46 }
 0x2a0   :  { %763 = vmatmul.mubr.msk.f32.vlgmr.msra.gmra.mrb[2].mxu0 %vm335_vm3, %v329_v48  ;;  %v330_v50 = vmul.f32 %v329_v48, %v329_v48 }
 0x2a1   :  { %773 = vmatprep.mubr.msk.f32.mxu0 %vm870_vm0, %v871_v4  ;;  %821 = vmatpush3.bf16.msra.mxu0 %v820_v57 }
 0x2a2   :  { %v332_v51 = vsub.f32 %v330_v50, %v331_v49  ;;  %822 = vmatprep.subr.bf16.mxu0 %v869_v2 }
 0x2a4   :  { %v333_v52 = vmul.f32 0.5, %v332_v51 }
 0x2a5   :  { %824 = vmatpush3.bf16.msra.mxu0 %v823_v60 }
 0x2a6   :  { %v334_v53 = vsub.f32 %v333_v52, %v325_v41  ;;  %831 = vmatprep.subr.bf16.mxu0 %v869_v2 }
 0x2a8   :  { %v336_v54 = vsel %vm335_vm3, %v334_v53, 0.0 }
 0x2a9   :  { %337 = vadd.xlane.f32.xlu0 %v336_v54 }
 0x336   :  { %v338_v39 = vpop.xlane.xlu0 %337 }
 0x373   :  { %v410_v5 = vpop.f32.mrb[2].mxu0 }
 0x374   :  { %v411_v6 = vadd.f32 %v410_v5, %v340_v0  ;;  %v764_v8 = vpop.f32.mrb[3].mxu0 }
 0x376   :  { %v414_v10 = vmax.f32 %v411_v6, 0.0 }
 0x378   :  { %774 = vmatmul.mubr.msk.f32.vlgmr.msra.gmra.mrb[4].mxu0 %vm97_vm2, %v414_v10 }
 0x379   :  { %833 = vmatpush3.bf16.msra.mxu0 %v832_v9  ;;  %795 = vmatprep.mubr.msk.f32.mxu0 %vm870_vm0, %v871_v4  ;;  %v835_v4 = vpack.c.bf16 %v575_v15, %v574_v13 }
 0x37a   :  { %834 = vmatprep.subr.bf16.mxu0 %v869_v2  ;;  %v419_v2 = vld [vmem:[%s1054_s1 + $0x100] sm:$0xff]  ;;  %s845_s1 = scalar_lea.vmem %s669_s26, 128 }
 0x37b   :  { %p846_p0 = scmp.ne.s32.totalorder %s669_s26, %s845_s1  ;;  %p851_p2 = scmp.lt.s32.totalorder %s845_s1, %s845_s1 }
 0x37d   :  { %836 = vmatpush3.bf16.msra.mxu0 %v835_v4  ;;  %p852_p3 = por %p851_p2, %p850_p1 }
 0x37f   :  { %p853_p4 = pnand %p852_p3, %p846_p0 }
 0x44b   :  { %v489_v16 = vpop.f32.mrb[4].mxu0 }
 0x44c   :  { %v490_v17 = vadd.f32 %v489_v16, %v419_v2  ;;  %v775_v18 = vpop.f32.mrb[5].mxu0 }
 0x44e   :  { %v493_v19 = vmax.f32 %v490_v17, 0.0 }
 0x450   :  { %785 = vmatmul.mubr.msk.f32.vlgmr.msra.gmra.mrb[6].mxu1 %vm97_vm2, %v493_v19  ;;  %796 = vmatmul.mubr.msk.f32.vlgmr.msra.gmra.mrb[6].mxu0 %vm97_vm2, %v493_v19 }
 0x523   :  { %v568_v21 = vpop.f32.mrb[6].mxu1  ;;  %v643_v22 = vpop.f32.mrb[6].mxu0 }
 0x524   :  { %v644_v23 = vadd.f32 %v643_v22, %v576_v20  ;;  %v786_v24 = vpop.f32.mrb[7].mxu1  ;;  %v797_v25 = vpop.f32.mrb[7].mxu0  ;;  %v569_v29 = vadd.f32 %v568_v21, %v498_v28 }
 0x526   :  { %v647_v26 = vsub.f32 0.0, %v644_v23  ;;  %v651_v31 = vsub.f32 %v650_v30, %v569_v29 }
 0x528   :  { %v648_v27 = vmul.f32 1.442695, %v647_v26  ;;  %v684_v35 = vadd.f32 -0.9189385, %v647_v26 }
 0x52a   :  { %843 = vpow2.f32 %v648_v27 }
 0x534   :  { %v844_v32 = vpop.eup %843 }
 0x535   :  { %v652_v33 = vmul.f32 %v844_v32, %v651_v31 }
 0x537   :  { %v654_v34 = vmul.f32 0.5, %v652_v33 }
 0x539   :  { %v655_v36 = vmul.f32 %v654_v34, %v652_v33 }
 0x53b   :  { %v656_v37 = vsub.f32 %v684_v35, %v655_v36 }
 0x53d   :  { %v657_v38 = vsel %vm17_vm1, %v656_v37, 0.0 }
 0x53e   :  { %658 = vadd.xlane.f32.xlu0 %v657_v38 }
 0x5cb   :  { %v659_v40 = vpop.xlane.xlu0 %658 }
 0x5cc   :  { %v660_v41 = vsub.f32 %v659_v40, %v338_v39 }
 0x5ce   :  { %661 = vst [vmem:[#allocation2] sm:$0xff] %v660_v41 }
 0x5cf   :  { %856 = shalt.err (!%p853_p4)
}
 0x5d0   :  { %s857_s29 = scalar_lea.hbm %s1055_s2, 128 }
 0x5d1   :  { %p858_p5 = scmp.ne.s32.totalorder %s1055_s2, %s857_s29  ;;  %p861_p6 = scmp.lt.u32.totalorder %s857_s29, %s1055_s2 }
 0x5d3   :  { %p863_p7 = pnand %p861_p6, %p858_p5 }
 0x5d5   :  { %866 = shalt.err (!%p863_p7)
}
 0x5d6   :  { %671 = dma.vmem_to_hbm [thread:$0]  %s669_s26, 128, %s1055_s2, [#allocation3]  }
 0x5d7   :  { %867 = dma.done.wait [#allocation3], 128  }
 0x5d8   :  { %868 = vsyncadd [#allocation3], 4294967168 }
 0x5d9   :  { %675 = vsyncpa [#allocation3], 1 }

</bundles_post_ra>
